<compile_context>
chip_gen: v5e
topology: v5e:2x2
jax: 0.10.0
libtpu: 0.0.40
codegen_flags: <defaults>
</compile_context>

<pallas_src>
import jax
import jax.numpy as jnp
from jax import lax
from jax.experimental import pallas as pl
from jax.experimental.pallas import tpu as pltpu


def _codescriminator_kernel(x_ref, w1_ref, b1_ref, w2_ref, b2_ref,
                            w3_ref, b3_ref, o_ref):
    """Fused 3-layer MLP; batch moves onto lanes at layer 1.

    x_ref : (TILE_B, Z) f32   (natural input layout, no wrapper transpose)
    w1_ref: (H1, Z) f32       b1_ref: (H1, 1) f32
    w2_ref: (H2, H1) f32      b2_ref: (H2, 1) f32
    w3_ref: (H2, 1) f32       b3_ref: (1, 1) f32 in SMEM
    o_ref : (1, TILE_B) f32   (lane-dense output)
    """
    x = x_ref[...]                                               # (T, Z) f32

    # layer 1: h1 = w1 @ x^T  -> (H1, T).  Transposed-RHS contraction puts the
    # batch on lanes without any explicit transpose or wrapper-side relayout.
    h1 = lax.dot_general(w1_ref[...], x, (((1,), (1,)), ((), ())),
                         preferred_element_type=jnp.float32)     # (H1, T)
    h1 = h1 + b1_ref[...]                                        # (H1,1) lane-bcast
    h1 = jnp.maximum(h1, 0.1 * h1)                               # LeakyReLU(0.1)

    # layer 2: Linear(H1, H2) + LeakyReLU(0.1), lane-dense
    h2 = jnp.dot(w2_ref[...], h1, preferred_element_type=jnp.float32)  # (H2, T)
    h2 = h2 + b2_ref[...]
    h2 = jnp.maximum(h2, 0.1 * h2)

    # last: Linear(H2, 1) + Sigmoid.  H2 is tiny (z/4), so do it as a VPU
    # multiply + sublane reduction instead of an M=1 MXU matmul.
    h3 = jnp.sum(h2 * w3_ref[...], axis=0, keepdims=True)        # (1, T)
    h3 = h3 + b3_ref[0, 0]                                       # SMEM scalar bias
    o_ref[...] = 1.0 / (1.0 + jnp.exp(-h3))                      # sigmoid


def _round_up(x, m):
    return (x + m - 1) // m * m


def _pick_tile_b(B, Z, H1, H2, vmem_budget_bytes=8 * 1024 * 1024):
    """Largest lane tile that (a) fits an explicit VMEM budget (double-buffered
    x + output + f32 intermediates + resident weights), and (b) yields >= 2
    grid steps when B >= 256 so both v7x TensorCores participate."""
    per_lane = 2 * Z * 4 + 2 * 4 + 2 * (H1 + H2 + 1) * 4          # x dbl-buf + out + temps
    fixed = 2 * 4 * (H1 * Z + H1 + H2 * H1 + H2 + H2 + 1)         # weights/biases (dbl-buf)
    cap = (max(vmem_budget_bytes - fixed, per_lane * 128) // per_lane) // 128 * 128
    cap = max(128, min(32768, cap))

    B_pad = _round_up(B, 128)
    if B_pad <= 128:
        return 128
    n_tiles = max(2, pl.cdiv(B_pad, cap)) if B_pad >= 256 else 1
    tile = min(cap, _round_up(pl.cdiv(B_pad, n_tiles), 128))

    # If B is already lane-aligned, prefer a tile that divides it exactly so the
    # wrapper never has to materialize a padded copy of x.
    if B % 128 == 0:
        units, t_units = B // 128, tile // 128
        for d in range(t_units, 0, -1):
            if units % d == 0:
                if d == t_units or d * 128 >= min(tile, 512):
                    return d * 128
                break
    return tile


def codescriminator_forward(x, params, tile_b=None):
    """x: (B, z_dim) or (B, z_dim, 1, 1). Returns (B,) f32 (scalar if B == 1)."""
    w1, b1, w2, b2, w3, b3 = params

    x = jnp.squeeze(jnp.asarray(x))        # mimic torch x.squeeze()
    if x.ndim == 1:                        # B == 1 degenerate case
        x = x[None, :]
    x = x.astype(jnp.float32)
    B, Z = x.shape
    H1 = w1.shape[0]
    H2 = w2.shape[0]
    assert w1.shape == (H1, Z) and w2.shape == (H2, H1) and w3.shape == (1, H2)

    if tile_b is None:
        tile_b = _pick_tile_b(B, Z, H1, H2)
    assert tile_b % 128 == 0 and tile_b > 0, "tile_b must be a positive multiple of 128"

    # Pad the batch up to a multiple of the lane tile (only copies when needed);
    # padded lanes compute garbage sigmoids that are sliced away below.
    B_pad = _round_up(B, tile_b)
    if B_pad != B:
        x = jnp.pad(x, ((0, B_pad - B), (0, 0)))

    grid = (B_pad // tile_b,)

    out = pl.pallas_call(
        _codescriminator_kernel,
        out_shape=jax.ShapeDtypeStruct((1, B_pad), jnp.float32),
        grid=grid,
        in_specs=[
            # x: streamed / pipelined over batch tiles, native (B, Z) layout
            pl.BlockSpec((tile_b, Z), lambda i: (i, 0)),
            # weights + biases: constant index_map -> VMEM-resident across steps
            pl.BlockSpec((H1, Z), lambda i: (0, 0)),
            pl.BlockSpec((H1, 1), lambda i: (0, 0)),
            pl.BlockSpec((H2, H1), lambda i: (0, 0)),
            pl.BlockSpec((H2, 1), lambda i: (0, 0)),
            pl.BlockSpec((H2, 1), lambda i: (0, 0)),
            # final scalar bias lives in SMEM
            pl.BlockSpec(memory_space=pltpu.MemorySpace.SMEM),
        ],
        out_specs=pl.BlockSpec((1, tile_b), lambda i: (0, i)),
        compiler_params=pltpu.CompilerParams(
            # batch tiles are independent -> shard across TensorCores on v7x
            dimension_semantics=("parallel",),
        ),
    )(
        x,
        w1.astype(jnp.float32), b1.astype(jnp.float32).reshape(H1, 1),
        w2.astype(jnp.float32), b2.astype(jnp.float32).reshape(H2, 1),
        w3.astype(jnp.float32).reshape(H2, 1),
        b3.astype(jnp.float32).reshape(1, 1),
    )

    return jnp.squeeze(out[0, :B])         # (B,)  (scalar if B == 1)


def init_params(key, z_dim):
    """nn.Linear-style U(-1/sqrt(fan_in), 1/sqrt(fan_in)) init.

    Weights in PyTorch's (out_features, in_features) layout; biases stored as
    (out_features, 1) columns for lane-broadcast bias-add."""
    h1 = z_dim // 2
    h2 = h1 // 2
    ks = jax.random.split(key, 6)

    def lin(kw, kb, fan_in, fan_out):
        bound = 1.0 / jnp.sqrt(jnp.float32(fan_in))
        w = jax.random.uniform(kw, (fan_out, fan_in), jnp.float32, -bound, bound)
        b = jax.random.uniform(kb, (fan_out, 1), jnp.float32, -bound, bound)
        return w, b

    w1, b1 = lin(ks[0], ks[1], z_dim, h1)
    w2, b2 = lin(ks[2], ks[3], h1, h2)
    w3, b3 = lin(ks[4], ks[5], h2, 1)
    return (w1, b1, w2, b2, w3, b3)


def _reference_forward(x, params):
    """Pure-JAX f32 reference (matches PyTorch semantics)."""
    w1, b1, w2, b2, w3, b3 = params
    x = jnp.squeeze(jnp.asarray(x)).astype(jnp.float32)
    if x.ndim == 1:
        x = x[None, :]
    hp = lax.Precision.HIGHEST
    h1 = jnp.dot(x, w1.T, precision=hp) + b1.reshape(1, -1)
    h1 = jnp.maximum(h1, 0.1 * h1)
    h2 = jnp.dot(h1, w2.T, precision=hp) + b2.reshape(1, -1)
    h2 = jnp.maximum(h2, 0.1 * h2)
    h3 = jnp.dot(h2, w3.T, precision=hp) + b3.reshape(1, -1)
    return jnp.squeeze(jax.nn.sigmoid(h3))


if __name__ == "__main__":
    key = jax.random.PRNGKey(0)
    k_x, k_p = jax.random.split(key)

    Z_DIM = 32     # z_dim -> z/2 -> z/4 -> 1
    BATCH = 256    # -> 2 lane tiles of 128 (pipelined, "parallel" grid axis)

    # PyTorch-style latent with trailing singleton spatial dims
    x = jax.random.normal(k_x, (BATCH, Z_DIM, 1, 1), dtype=jnp.float32)
    params = init_params(k_p, Z_DIM)

    y = jax.block_until_ready(codescriminator_forward(x, params))
    assert y.shape == (BATCH,), y.shape
    y_ref = _reference_forward(x, params)
    assert jnp.allclose(y, y_ref, atol=2e-3, rtol=2e-3), \
        float(jnp.max(jnp.abs(y - y_ref)))

    # Unaligned batch exercises the pad-to-lane-tile + slice path.
    x2 = jax.random.normal(k_x, (50, Z_DIM, 1, 1), dtype=jnp.float32)
    y2 = jax.block_until_ready(codescriminator_forward(x2, params))
    assert y2.shape == (50,), y2.shape
    y2_ref = _reference_forward(x2, params)
    assert jnp.allclose(y2, y2_ref, atol=2e-3, rtol=2e-3), \
        float(jnp.max(jnp.abs(y2 - y2_ref)))

    print("KERNEL_OK")
</pallas_src>

<mosaic_0001>
module attributes {stable_mosaic.version = 11 : i64} {
  func.func @_codescriminator_kernel(%arg0: i32, %arg1: memref<128x32xf32, #tpu.memory_space<vmem>>, %arg2: memref<16x32xf32, #tpu.memory_space<vmem>>, %arg3: memref<16x1xf32, #tpu.memory_space<vmem>>, %arg4: memref<8x16xf32, #tpu.memory_space<vmem>>, %arg5: memref<8x1xf32, #tpu.memory_space<vmem>>, %arg6: memref<8x1xf32, #tpu.memory_space<vmem>>, %arg7: memref<1x1xf32, #tpu.memory_space<smem>>, %arg8: memref<1x128xf32, #tpu.memory_space<vmem>>) attributes {dimension_semantics = [#tpu.dimension_semantics<parallel>], iteration_bounds = array<i64: 2>, scalar_prefetch = 0 : i64, scratch_operands = 0 : i64, tpu.core_type = #tpu.core_type<tc>, window_params = [{transform_indices = @transform_0, window_bounds = array<i64: 128, 32>}, {pipeline_mode = #tpu.pipeline_mode<synchronous>, transform_indices = @transform_1, window_bounds = array<i64: 16, 32>}, {pipeline_mode = #tpu.pipeline_mode<synchronous>, transform_indices = @transform_2, window_bounds = array<i64: 16, 1>}, {pipeline_mode = #tpu.pipeline_mode<synchronous>, transform_indices = @transform_3, window_bounds = array<i64: 8, 16>}, {pipeline_mode = #tpu.pipeline_mode<synchronous>, transform_indices = @transform_4, window_bounds = array<i64: 8, 1>}, {pipeline_mode = #tpu.pipeline_mode<synchronous>, transform_indices = @transform_5, window_bounds = array<i64: 8, 1>}, {transform_indices = @transform_6, window_bounds = array<i64: 1, 1>}, {transform_indices = @transform_7, window_bounds = array<i64: 1, 128>}]} {
    %c0 = arith.constant 0 : index
    %c0_0 = arith.constant 0 : index
    %0 = vector.load %arg1[%c0, %c0_0] : memref<128x32xf32, #tpu.memory_space<vmem>>, vector<128x32xf32>
    %c0_1 = arith.constant 0 : index
    %c0_2 = arith.constant 0 : index
    %1 = vector.load %arg2[%c0_1, %c0_2] : memref<16x32xf32, #tpu.memory_space<vmem>>, vector<16x32xf32>
    %cst = arith.constant dense<0.000000e+00> : vector<16x128xf32>
    %2 = tpu.matmul %1, %0, %cst {dimension_numbers = #tpu.dot_dimension_numbers<[1], [1], [0], [0], [0, 0, 1, 0], [], []>} : vector<16x32xf32>, vector<128x32xf32>, vector<16x128xf32> -> vector<16x128xf32>
    %c0_3 = arith.constant 0 : index
    %c0_4 = arith.constant 0 : index
    %3 = vector.load %arg3[%c0_3, %c0_4] : memref<16x1xf32, #tpu.memory_space<vmem>>, vector<16x1xf32>
    %4 = vector.broadcast %3 : vector<16x1xf32> to vector<16x128xf32>
    %5 = arith.addf %2, %4 : vector<16x128xf32>
    %cst_5 = arith.constant 1.000000e-01 : f32
    %6 = vector.broadcast %cst_5 : f32 to vector<16x128xf32>
    %7 = arith.mulf %6, %5 : vector<16x128xf32>
    %8 = arith.maximumf %5, %7 : vector<16x128xf32>
    %c0_6 = arith.constant 0 : index
    %c0_7 = arith.constant 0 : index
    %9 = vector.load %arg4[%c0_6, %c0_7] : memref<8x16xf32, #tpu.memory_space<vmem>>, vector<8x16xf32>
    %cst_8 = arith.constant dense<0.000000e+00> : vector<8x128xf32>
    %10 = tpu.matmul %9, %8, %cst_8 {dimension_numbers = #tpu.dot_dimension_numbers<[1], [0], [0], [1], [0, 0, 1, 1], [], []>} : vector<8x16xf32>, vector<16x128xf32>, vector<8x128xf32> -> vector<8x128xf32>
    %c0_9 = arith.constant 0 : index
    %c0_10 = arith.constant 0 : index
    %11 = vector.load %arg5[%c0_9, %c0_10] : memref<8x1xf32, #tpu.memory_space<vmem>>, vector<8x1xf32>
    %12 = vector.broadcast %11 : vector<8x1xf32> to vector<8x128xf32>
    %13 = arith.addf %10, %12 : vector<8x128xf32>
    %cst_11 = arith.constant 1.000000e-01 : f32
    %14 = vector.broadcast %cst_11 : f32 to vector<8x128xf32>
    %15 = arith.mulf %14, %13 : vector<8x128xf32>
    %16 = arith.maximumf %13, %15 : vector<8x128xf32>
    %c0_12 = arith.constant 0 : index
    %c0_13 = arith.constant 0 : index
    %17 = vector.load %arg6[%c0_12, %c0_13] : memref<8x1xf32, #tpu.memory_space<vmem>>, vector<8x1xf32>
    %18 = vector.broadcast %17 : vector<8x1xf32> to vector<8x128xf32>
    %19 = arith.mulf %16, %18 : vector<8x128xf32>
    %cst_14 = arith.constant dense<0.000000e+00> : vector<128xf32>
    %20 = vector.multi_reduction <add>, %19, %cst_14 [0] : vector<8x128xf32> to vector<128xf32>
    %21 = vector.shape_cast %20 : vector<128xf32> to vector<1x128xf32>
    %c0_15 = arith.constant 0 : index
    %c0_16 = arith.constant 0 : index
    %22 = memref.load %arg7[%c0_15, %c0_16] : memref<1x1xf32, #tpu.memory_space<smem>>
    %23 = vector.broadcast %22 : f32 to vector<1x128xf32>
    %24 = arith.addf %21, %23 : vector<1x128xf32>
    %cst_17 = arith.constant 0.000000e+00 : f32
    %25 = vector.broadcast %cst_17 : f32 to vector<1x128xf32>
    %26 = arith.subf %25, %24 : vector<1x128xf32>
    %27 = math.exp %26 : vector<1x128xf32>
    %cst_18 = arith.constant 1.000000e+00 : f32
    %28 = vector.broadcast %cst_18 : f32 to vector<1x128xf32>
    %29 = arith.addf %28, %27 : vector<1x128xf32>
    %cst_19 = arith.constant 1.000000e+00 : f32
    %30 = vector.broadcast %cst_19 : f32 to vector<1x128xf32>
    %31 = arith.divf %30, %29 : vector<1x128xf32>
    %c0_20 = arith.constant 0 : index
    %c0_21 = arith.constant 0 : index
    %32 = vector.load %arg8[%c0_20, %c0_21] : memref<1x128xf32, #tpu.memory_space<vmem>>, vector<1x128xf32>
    tpu.vector_store %arg8[%c0_20, %c0_21], %31 {strides = array<i32>} : memref<1x128xf32, #tpu.memory_space<vmem>>, vector<1x128xf32>,
    return
  }
  func.func @transform_0(%arg0: i32) -> (i32, i32) {
    %c0_i32 = arith.constant 0 : i32
    %c0_i32_0 = arith.constant 0 : i32
    return %arg0, %c0_i32 : i32, i32
  }
  func.func @transform_1(%arg0: i32) -> (i32, i32) {
    %c0_i32 = arith.constant 0 : i32
    %c0_i32_0 = arith.constant 0 : i32
    %c0_i32_1 = arith.constant 0 : i32
    return %c0_i32, %c0_i32_0 : i32, i32
  }
  func.func @transform_2(%arg0: i32) -> (i32, i32) {
    %c0_i32 = arith.constant 0 : i32
    %c0_i32_0 = arith.constant 0 : i32
    %c0_i32_1 = arith.constant 0 : i32
    return %c0_i32, %c0_i32_0 : i32, i32
  }
  func.func @transform_3(%arg0: i32) -> (i32, i32) {
    %c0_i32 = arith.constant 0 : i32
    %c0_i32_0 = arith.constant 0 : i32
    %c0_i32_1 = arith.constant 0 : i32
    return %c0_i32, %c0_i32_0 : i32, i32
  }
  func.func @transform_4(%arg0: i32) -> (i32, i32) {
    %c0_i32 = arith.constant 0 : i32
    %c0_i32_0 = arith.constant 0 : i32
    %c0_i32_1 = arith.constant 0 : i32
    return %c0_i32, %c0_i32_0 : i32, i32
  }
  func.func @transform_5(%arg0: i32) -> (i32, i32) {
    %c0_i32 = arith.constant 0 : i32
    %c0_i32_0 = arith.constant 0 : i32
    %c0_i32_1 = arith.constant 0 : i32
    return %c0_i32, %c0_i32_0 : i32, i32
  }
  func.func @transform_6(%arg0: i32) -> (i32, i32) {
    %c0_i32 = arith.constant 0 : i32
    %c0_i32_0 = arith.constant 0 : i32
    %c0_i32_1 = arith.constant 0 : i32
    return %c0_i32, %c0_i32_0 : i32, i32
  }
  func.func @transform_7(%arg0: i32) -> (i32, i32) {
    %c0_i32 = arith.constant 0 : i32
    %c0_i32_0 = arith.constant 0 : i32
    return %c0_i32, %arg0 : i32, i32
  }
}

</mosaic_0001>

<bundles_post_ra>
// kernel: tpu_custom_call.1
= control target key start
LH: loop header
LB: loop body
LE: loop exit
PB: predicated region body
PF: predicated region fallthrough
CT: control target
= control target key end

     0   :  { %s882_s0 = inlined_call_operand.vmem [shape: f32[256,32], index: 0, kind: input, shape index: {}]   ;;  %s883_s1 = inlined_call_operand.vmem [shape: f32[16,32], index: 1, kind: input, shape index: {}]   ;;  %s884_s2 = inlined_call_operand.vmem [shape: f32[16,1], index: 2, kind: input, shape index: {}]   ;;  %s885_s3 = inlined_call_operand.vmem [shape: f32[8,16], index: 3, kind: input, shape index: {}]   ;;  %s886_s4 = inlined_call_operand.vmem [shape: f32[8,1], index: 4, kind: input, shape index: {}]   ;;  %s887_s5 = inlined_call_operand.vmem [shape: f32[8,1], index: 5, kind: input, shape index: {}]   ;;  %s888_s6 = inlined_call_operand.<no memory space> [shape: f32[1,1], index: 6, kind: input, shape index: {}]   ;;  %s889_s7 = inlined_call_operand.hbm [shape: f32[1,256], index: 7, kind: output, shape index: {}]  }
   0x1   :  { %12 = sst [smem:[#allocation2]] %s888_s6 }
   0x2   :  { %13 = vsyncpa [#allocation4], 0 }
   0x3   :  { %15 = vsyncpa [#allocation4 + $0x1], 0  ;;  %s725_s26 = smov 0   ;;  %s727_s27 = smov 0  }
   0x4   :  { %s729_s28 = smov 0   ;;  %s731_s29 = smov 0  }
   0x5 LB: > { %s746_s6 = sadd.s32 4294967295, %s679_s29   ;;  %s528_s30 = sadd.s32 4294967294, %s679_s29   ;;  %s679_s29 = sphi %s731_s29, %s895_s29   ;;  %s675_s28 = sphi %s729_s28, %s894_s28   ;;  %s671_s27 = sphi %s727_s27, %s893_s27   ;;  %s667_s26 = sphi %s725_s26, %s892_s26  }
   0x6   : > { %s750_s8 = sadd.s32 1, %s679_s29   ;;  %s180_s9 = sadd.s32 1, %s675_s28 }
   0x7   : > { %s177_s10 = ssub.s32 %s679_s29, %s750_s8  ;;  %p190_p0 = scmp.ne.s32.totalorder %s675_s28, %s671_s27 }
   0x8   : > { %p178_p1 = scmp.eq.s32.totalorder %s177_s10, 0  ;;  %p191_p2 = scmp.eq.s32.totalorder %s746_s6, 1 }
   0x9   : > { %p196_p3 = scmp.ne.s32.totalorder %s671_s27, %s667_s26  ;;  %p197_p4 = scmp.eq.s32.totalorder %s528_s30, 1 }
   0xa   : > { %s761_s11 = scalar_select %p178_p1, %s675_s28, %s180_s9  }
   0xb   : > { %p763_p5 = por %p191_p2, %p190_p0  ;;  %p767_p6 = por %p197_p4, %p196_p3 }
   0xc   : > { %p531_p7 = scmp.ge.s32.totalorder %s679_s29, 1  ;;  %p242_p8 = scmp.lt.s32.totalorder %s679_s29, 3 }
   0xe   : > { %p243_p9 = pnand %p531_p7, %p242_p8 }
   0xf   : > { %s532_s14 = sshll.u32 (!%p243_p9), %s746_s6, 4  ;;  %s271_s19 = sand.u32 (!%p243_p9), 1, %s671_s27  }
  0x10   : > { %246 = sbr.rel (%p243_p9) target bundleno = 410 (0x19a), region = 48  ;;  %p274_p10 = scmp.lt.s32.totalorder (!%p243_p9), %s532_s14, 31 }
  0x11   : > { %s469_s22 = scalar_lea.hbm (!%p243_p9), %s889_s7, %s746_s6  ;;  %s272_s23 = scalar_lea.vmem (!%p243_p9), [#allocation3], %s271_s19 }
  0x12   : > { %s471_s24 = sshll.u32 (!%p243_p9), %s272_s23, 4  ;;  %s473_s25 = sshll.u32 (!%p243_p9), %s469_s22, 4  ;;  %s472_s24 = int_to_ptr.vmem [resolvable:$true] %s471_s24  ;;  %s474_s25 = int_to_ptr.hbm [resolvable:$true] %s473_s25 }
  0x13   : > { %s461_s30 = scalar_lea.sflag (!%p243_p9), [#allocation4], %s271_s19  ;;  %s631_s6 = sshra.s32 (!%p243_p9), %s474_s25, 4  ;;  %s632_s6 = int_to_ptr.hbm [resolvable:$true] %s631_s6 }
  0x14   : > { %s633_s9 = scalar_lea.hbm (!%p243_p9), %s632_s6, 1  ;;  %p638_p0 = scmp.lt.s32.totalorder (!%p243_p9), %s632_s6, %s889_s7 }
  0x15   : > { %s897_s14 = smov (!%p274_p10, %s532_s14), 31  ;;  %vm309_vm0 = vcmask 261120   ;;  %v298_v9 = vld [vmem:[%s884_s2 + $0x8] sm:$0xff]  ;;  %v681_v11 = vmov 0   ;;  %v297_v13 = vld [vmem:[%s884_s2] sm:$0xff]  ;;  %vm398_vm1 = vcmask 130048   ;;  %p634_p11 = scmp.ne.s32.totalorder %s632_s6, %s633_s9 }
  0x16   : > { %s533_s15 = sshll.u32 %s897_s14, 3  ;;  %611 = vset.pattern.permute.xlu0 %v681_v11  ;;  %612 = vset.pattern.permute.xlu1 %v681_v11  ;;  %v295_v19 = vld [vmem:[%s883_s1] sm:$0xff]  ;;  %v296_v20 = vld [vmem:[%s883_s1 + $0x8] sm:$0xff] }
  0x17   : > { %s777_s18 = scalar_lea.vmem %s882_s0, %s533_s15  ;;  %306 = vperm.xlu0 %611, %v298_v9   ;;  %v392_v21 = vld [vmem:[%s886_s4] sm:$0xff]  ;;  %p635_p12 = pnand %p634_p11, %p763_p5 }
  0x18   : > { %v294_v0 = vld [vmem:[%s777_s18 + $0x78] sm:$0xff]  ;;  %v293_v1 = vld [vmem:[%s777_s18 + $0x70] sm:$0xff]  ;;  %v292_v2 = vld [vmem:[%s777_s18 + $0x68] sm:$0xff]  ;;  %395 = vperm.xlu1 %612, %v392_v21   ;;  %s637_s15 = scalar_lea.hbm %s889_s7, 2 }
  0x19   : > { %534 = vmatpush.xpose.msk.msra.mxu0 %vm309_vm0, %v294_v0  ;;  %555 = vmatpush.xpose.msk.msra.mxu2 %vm309_vm0, %v294_v0  ;;  %v291_v3 = vld [vmem:[%s777_s18 + $0x60] sm:$0xff]  ;;  %v290_v4 = vld [vmem:[%s777_s18 + $0x58] sm:$0xff]  ;;  %v289_v5 = vld [vmem:[%s777_s18 + $0x50] sm:$0xff]  ;;  %p636_p13 = pneg %p635_p12  ;;  %p639_p1 = scmp.lt.s32.totalorder %s637_s15, %s633_s9 }
  0x1a   : > { %v288_v6 = vld [vmem:[%s777_s18 + $0x48] sm:$0xff]  ;;  %v287_v7 = vld [vmem:[%s777_s18 + $0x40] sm:$0xff]  ;;  %v286_v8 = vld [vmem:[%s777_s18 + $0x38] sm:$0xff] }
  0x1b   : > { %v285_v10 = vld [vmem:[%s777_s18 + $0x30] sm:$0xff]  ;;  %v284_v12 = vld [vmem:[%s777_s18 + $0x28] sm:$0xff]  ;;  %v283_v14 = vld [vmem:[%s777_s18 + $0x20] sm:$0xff]  ;;  %p640_p2 = por %p639_p1, %p638_p0 }
  0x1c   : > { %v282_v15 = vld [vmem:[%s777_s18 + $0x18] sm:$0xff]  ;;  %v281_v16 = vld [vmem:[%s777_s18 + $0x10] sm:$0xff]  ;;  %v280_v17 = vld [vmem:[%s777_s18 + $0x8] sm:$0xff] }
  0x1d   : > { %535 = vmatpush.xpose.msk.msra.mxu0 %vm309_vm0, %v293_v1  ;;  %556 = vmatpush.xpose.msk.msra.mxu2 %vm309_vm0, %v293_v1  ;;  %v279_v18 = vld [vmem:[%s777_s18] sm:$0xff]  ;;  %s437_s18 = sld [smem:[#allocation2]]  ;;  %p641_p3 = pnand %p640_p2, %p636_p13 }
  0x1e   : > { %v424_v22 = vld [vmem:[%s887_s5] sm:$0xff] }
  0x1f   : > { %301 = vperm.xlu0 %611, %v297_v13   ;;  %v391_v33 = vld [vmem:[%s885_s3] sm:$0xff] }
  0x20   : > { %427 = vperm.xlu1 %612, %v424_v22  }
  0x21   : > { %536 = vmatpush.xpose.msk.msra.mxu0 %vm309_vm0, %v292_v2  ;;  %557 = vmatpush.xpose.msk.msra.mxu2 %vm309_vm0, %v292_v2 }
  0x23   : > { %v438_v46 = vstv %s437_s18 }
  0x25   : > { %537 = vmatpush.xpose.msk.msra.mxu0 %vm309_vm0, %v291_v3  ;;  %558 = vmatpush.xpose.msk.msra.mxu2 %vm309_vm0, %v291_v3 }
  0x29   : > { %538 = vmatpush.xpose.msk.msra.mxu0 %vm309_vm0, %v290_v4  ;;  %559 = vmatpush.xpose.msk.msra.mxu2 %vm309_vm0, %v290_v4 }
  0x2d   : > { %539 = vmatpush.xpose.msk.msra.mxu0 %vm309_vm0, %v289_v5  ;;  %560 = vmatpush.xpose.msk.msra.mxu2 %vm309_vm0, %v289_v5 }
  0x31   : > { %540 = vmatpush.xpose.msk.msra.mxu0 %vm309_vm0, %v288_v6  ;;  %561 = vmatpush.xpose.msk.msra.mxu2 %vm309_vm0, %v288_v6 }
  0x35   : > { %541 = vmatpush.xpose.msk.msra.mxu0 %vm309_vm0, %v287_v7  ;;  %562 = vmatpush.xpose.msk.msra.mxu2 %vm309_vm0, %v287_v7 }
  0x39   : > { %542 = vmatpush.xpose.msk.msra.mxu0 %vm309_vm0, %v286_v8  ;;  %563 = vmatpush.xpose.msk.msra.mxu2 %vm309_vm0, %v286_v8 }
  0x3d   : > { %543 = vmatpush.xpose.msk.msra.mxu0 %vm309_vm0, %v285_v10  ;;  %564 = vmatpush.xpose.msk.msra.mxu2 %vm309_vm0, %v285_v10 }
  0x41   : > { %544 = vmatpush.xpose.msk.msra.mxu0 %vm309_vm0, %v284_v12  ;;  %565 = vmatpush.xpose.msk.msra.mxu2 %vm309_vm0, %v284_v12 }
  0x45   : > { %545 = vmatpush.xpose.msk.msra.mxu0 %vm309_vm0, %v283_v14  ;;  %566 = vmatpush.xpose.msk.msra.mxu2 %vm309_vm0, %v283_v14 }
  0x49   : > { %546 = vmatpush.xpose.msk.msra.mxu0 %vm309_vm0, %v282_v15  ;;  %567 = vmatpush.xpose.msk.msra.mxu2 %vm309_vm0, %v282_v15 }
  0x4d   : > { %547 = vmatpush.xpose.msk.msra.mxu0 %vm309_vm0, %v281_v16  ;;  %568 = vmatpush.xpose.msk.msra.mxu2 %vm309_vm0, %v281_v16 }
  0x51   : > { %548 = vmatpush.xpose.msk.msra.mxu0 %vm309_vm0, %v280_v17  ;;  %569 = vmatpush.xpose.msk.msra.mxu2 %vm309_vm0, %v280_v17 }
  0x55   : > { %549 = vmatpush.xpose.msk.msra.mxu0 %vm309_vm0, %v279_v18  ;;  %570 = vmatpush.xpose.msk.msra.mxu2 %vm309_vm0, %v279_v18 }
  0x58   : > { %550 = vmatmul.msk.f32.vlgmr.msra.gmra.mxu0 %vm309_vm0, %v295_v19  ;;  %551 = vmatmul.msk.f32.vlgmr.msra.gmra.mxu2 %vm309_vm0, %v296_v20 }
  0x89   : > { %v307_v23 = vpop.permute.xlu0 %306 }
  0x8a   : > { %v396_v34 = vpop.permute.xlu1 %395 }
  0x91   : > { %v302_v24 = vpop.permute.xlu0 %301 }
  0x92   : > { %v428_v39 = vpop.permute.xlu1 %427 }
  0xd5   : > { %v381_v25 = vpop.f32.mrf.mxu0 }
  0xd6   : > { %v382_v26 = vadd.f32 %v381_v25, %v302_v24 }
  0xd8   : > { %v387_v29 = vmul.f32 0.1, %v382_v26 }
  0xda   : > { %v389_v32 = vmax.f32 %v382_v26, %v387_v29 }
  0xdb   : > { %v384_v27 = vpop.f32.mrf.mxu2 }
  0xdc   : > { %v385_v28 = vadd.f32 %v384_v27, %v307_v23 }
  0xde   : > { %v388_v30 = vmul.f32 0.1, %v385_v28 }
  0xe0   : > { %v390_v31 = vmax.f32 %v385_v28, %v388_v30 }
  0xe2   : > { %416 = vmatpush.msra.mxu1 %v390_v31 }
  0xe4   : > { %417 = vmatpush.msra.mxu1 %v389_v32 }
  0xe5   : > { %552 = vmatmul.msk.f32.vlgmr.msra.gmra.mxu1 %vm398_vm1, %v391_v33 }
 0x162   : > { %v419_v35 = vpop.f32.mrf.mxu1 }
 0x163   : > { %v420_v36 = vadd.f32 %v419_v35, %v396_v34 }
 0x165   : > { %v422_v37 = vmul.f32 0.1, %v420_v36 }
 0x167   : > { %v423_v38 = vmax.f32 %v420_v36, %v422_v37 }
 0x169   : > { %v430_v40 = vmul.f32 %v428_v39, %v423_v38 }
 0x16b   : > { %v431_v41 = vrot.slane %v430_v40, 4 }
 0x16d   : > { %v432_v42 = vadd.f32 %v431_v41, %v430_v40 }
 0x16f   : > { %v433_v43 = vrot.slane %v432_v42, 2 }
 0x171   : > { %v434_v44 = vadd.f32 %v433_v43, %v432_v42 }
 0x173   : > { %v435_v45 = vrot.slane %v434_v44, 1 }
 0x175   : > { %v436_v47 = vadd.f32 %v435_v45, %v434_v44 }
 0x177   : > { %v439_v48 = vadd.f32 %v438_v46, %v436_v47 }
 0x179   : > { %v440_v49 = vsub.f32 0.0, %v439_v48 }
 0x17b   : > { %v441_v50 = vmul.f32 1.442695, %v440_v49 }
 0x17d   : > { %613 = vpow2.f32 %v441_v50 }
 0x183   : > { %v614_v51 = vpop.eup %613 }
 0x184   : > { %v443_v52 = vadd.f32 1.0, %v614_v51 }
 0x186   : > { %615 = vrcp.f32 %v443_v52  ;;  %v455_v56 = vand.u32 2147483648, %v443_v52  ;;  %v453_v58 = vand.u32 2147483647, %v443_v52  ;;  %vm449_vm3 = vweird.f32 %v443_v52 }
 0x188   : > { %v456_v60 = vor.u32 1.1754944e-38, %v455_v56  ;;  %vm454_vm5 = vcmp.eq.f32.partialorder %v453_v58, 8.507059e+37 }
 0x18c   : > { %v616_v53 = vpop.eup %615 }
 0x18d   : > { %v445_v54 = vmul.f32 %v616_v53, %v443_v52  ;;  %vm450_vm2 = vweird.f32 %v616_v53 }
 0x18e   : > { %vm451_vm4 = vmor %vm449_vm3, %vm450_vm2 }
 0x18f   : > { %v446_v55 = vsub.f32 1.0, %v445_v54 }
 0x191   : > { %v447_v57 = vmul.f32 %v616_v53, %v446_v55 }
 0x193   : > { %v448_v59 = vadd.f32 %v616_v53, %v447_v57 }
 0x195   : > { %v452_v61 = vsel %vm451_vm4, %v616_v53, %v448_v59 }
 0x196   : > { %v457_v62 = vsel %vm454_vm5, %v456_v60, %v452_v61 }
 0x197   : > { %459 = vst [vmem:[%s272_s23] sm:$0x1] %v457_v62 }
 0x198   : > { %644 = shalt.err (!%p641_p3)
}
 0x199   : > { %571 = dma.vmem_to_hbm [thread:$0]  (%p763_p5), %s472_s24, 16, %s474_s25, %s461_s30  }
 0x19a PF: > { %p577_p4 = scmp.ge.s32.totalorder %s679_s29, 2  ;;  %s485_s18 = sand.u32 1, %s667_s26  }
 0x19b   : > { %s486_s19 = scalar_lea.sflag [#allocation4], %s485_s18 }
 0x19c   : > { %p574_p7 = pnand %p577_p4, %p767_p6 }
 0x19e   : > { %p575_p8 = pneg %p574_p7 }
 0x1a0   : > { %662 = dma.done.wait (%p575_p8), %s486_s19, 16  }
 0x1a1   : > { %664 = vsyncadd (%p575_p8), %s486_s19, 4294967280  ;;  %p18_p9 = scmp.ge.s32.totalorder %s750_s8, 4   ;;  %s892_s26 = smov %s671_s27 }
 0x1a2   : > { %s893_s27 = smov %s675_s28  ;;  %s894_s28 = smov %s761_s11 }
 0x1a3   : > { %s895_s29 = smov %s750_s8  ;;  %20 = sbr.rel (!%p18_p9) target bundleno = 5 (0x5), region = 83 }
 0x1a8   :  { %491 = vsyncpa [#allocation4], 1 }
 0x1a9   :  { %493 = vsyncpa [#allocation4 + $0x1], 1 }

</bundles_post_ra>
